<compile_context>
chip_gen: v6e
topology: v6e:2x2x1
jax: 0.10.0
libtpu: 0.0.40
codegen_flags: <defaults>
</compile_context>

<pallas_src>
import functools

import jax
import jax.numpy as jnp
from jax import lax
from jax.experimental import pallas as pl
from jax.experimental.pallas import tpu as pltpu


def _gnn_edge_kernel(tb, ep,
                     src_ref, dst_ref, x_ref,
                     w1_ref, b1_ref, w2_ref, b2_ref, w3_ref, b3_ref,
                     wf_ref, bf_ref, o_ref):
    """One batch tile (tb samples) per grid step: build normalized line-graph
    adjacency in VMEM, run 3x GCNConv+ReLU, then the final Linear."""
    src = src_ref[...]                                      # [tb, ep, 1] int32
    dst = dst_ref[...]                                      # [tb, 1, ep] int32

    # Directed LineGraph adjacency: A[b, i, j] = 1 iff dst(edge_j) == src(edge_i).
    adj = jnp.where(src == dst, 1.0, 0.0)                   # [tb, ep, ep] f32
    rows = lax.broadcasted_iota(jnp.int32, (ep, ep), 0)
    cols = lax.broadcasted_iota(jnp.int32, (ep, ep), 1)
    eye = jnp.where(rows == cols, 1.0, 0.0)
    adj = jnp.maximum(adj, eye[None, :, :])                 # add_remaining_self_loops

    # gcn_norm: M = D^-1/2 (A+I) D^-1/2, applied as dinv * (A @ (dinv * h)).
    deg = jnp.sum(adj, axis=-1, keepdims=True)              # [tb, ep, 1], deg >= 1
    dinv = lax.rsqrt(deg)                                   # EUP

    def gcn_layer(h, w_ref, b_ref):
        # Aggregate: M @ h  (batched over the tile).
        t = jnp.einsum("bij,bjk->bik", adj, dinv * h,
                       preferred_element_type=jnp.float32)
        t = dinv * t                                        # [tb, ep, Cin]
        # Transform: flatten the batch tile -> one big MXU matmul.
        t2 = t.reshape(tb * ep, t.shape[-1])
        t2 = jnp.dot(t2, w_ref[...], preferred_element_type=jnp.float32) + b_ref[...]
        t2 = jnp.maximum(t2, 0.0)                           # ReLU
        return t2.reshape(tb, ep, t2.shape[-1])

    h = x_ref[...]                                          # [tb, ep, Fin] edge_attr
    h = gcn_layer(h, w1_ref, b1_ref)
    h = gcn_layer(h, w2_ref, b2_ref)
    h = gcn_layer(h, w3_ref, b3_ref)

    # Final Linear(64 -> features_dim), no ReLU, no aggregation.
    h2 = h.reshape(tb * ep, h.shape[-1])
    out = jnp.dot(h2, wf_ref[...], preferred_element_type=jnp.float32) + bf_ref[...]
    o_ref[...] = out.reshape(tb, ep, out.shape[-1]).astype(o_ref.dtype)


def _pick_batch_tile(batch: int, ep: int) -> int:
    """Largest divisor of batch such that the per-step working set stays small."""
    best = 1
    for d in range(1, batch + 1):
        if batch % d == 0 and d * ep <= 1024 and d * ep * ep * 4 <= (8 << 20):
            best = d
    return best


def gnn_edge_extractor(observations: dict, params: dict) -> jax.Array:
    """Pallas forward pass matching GNNEdgeExtractor.forward.

    observations: {'x': [B,N,Fn], 'edge_index': [B,2,E] int, 'edge_attr': [B,E,Fin]}
    Note: 'x' (node features) is discarded by the LineGraph transform, exactly as in
    the PyTorch module. Returns [B, E, features_dim].
    """
    # TODO(synk): only the directed LineGraph path is replicated; PyG's undirected
    # merge and coalesce-sorting of duplicate edges are not.
    edge_index = observations["edge_index"].astype(jnp.int32)
    edge_attr = observations["edge_attr"].astype(jnp.float32)
    B, E, Fin = edge_attr.shape

    src = edge_index[:, 0, :]                                # [B, E]
    dst = edge_index[:, 1, :]                                # [B, E]

    # Pad E up to a multiple of 8 (sublane alignment). Sentinel ids never match a
    # real node id, so padded line-graph nodes only self-loop and never feed real rows.
    Ep = ((E + 7) // 8) * 8
    if Ep != E:
        pad = Ep - E
        src = jnp.pad(src, ((0, 0), (0, pad)), constant_values=-1)
        dst = jnp.pad(dst, ((0, 0), (0, pad)), constant_values=-2)
        edge_attr = jnp.pad(edge_attr, ((0, 0), (0, pad), (0, 0)))

    src = src[:, :, None]                                    # [B, Ep, 1]
    dst = dst[:, None, :]                                    # [B, 1, Ep]

    w1, b1 = params["w1"], params["b1"]
    w2, b2 = params["w2"], params["b2"]
    w3, b3 = params["w3"], params["b3"]
    wf, bf = params["wf"], params["bf"]
    h1, h2, h3, fd = w1.shape[1], w2.shape[1], w3.shape[1], wf.shape[1]

    TB = _pick_batch_tile(B, Ep)
    kernel = functools.partial(_gnn_edge_kernel, TB, Ep)

    out = pl.pallas_call(
        kernel,
        out_shape=jax.ShapeDtypeStruct((B, Ep, fd), jnp.float32),
        grid=(B // TB,),
        in_specs=[
            pl.BlockSpec((TB, Ep, 1), lambda b: (b, 0, 0)),       # src ids (per tile)
            pl.BlockSpec((TB, 1, Ep), lambda b: (b, 0, 0)),       # dst ids (per tile)
            pl.BlockSpec((TB, Ep, Fin), lambda b: (b, 0, 0)),     # edge_attr (per tile)
            pl.BlockSpec((Fin, h1), lambda b: (0, 0)),            # W1
            pl.BlockSpec((1, h1), lambda b: (0, 0)),              # b1
            pl.BlockSpec((h1, h2), lambda b: (0, 0)),             # W2
            pl.BlockSpec((1, h2), lambda b: (0, 0)),              # b2
            pl.BlockSpec((h2, h3), lambda b: (0, 0)),             # W3
            pl.BlockSpec((1, h3), lambda b: (0, 0)),              # b3
            pl.BlockSpec((h3, fd), lambda b: (0, 0)),             # Wfc
            pl.BlockSpec((1, fd), lambda b: (0, 0)),              # bfc
        ],
        out_specs=pl.BlockSpec((TB, Ep, fd), lambda b: (b, 0, 0)),
        compiler_params=pltpu.CompilerParams(
            dimension_semantics=("parallel",),   # shard batch tiles across TensorCores
        ),
    )(src, dst, edge_attr, w1, b1, w2, b2, w3, b3, wf, bf)

    return out[:, :E, :]


def _reference(observations, params):
    """Pure-JAX reference of the same math (correctness check)."""
    edge_index = observations["edge_index"]
    edge_attr = observations["edge_attr"].astype(jnp.float32)
    E = edge_attr.shape[1]
    src = edge_index[:, 0, :]
    dst = edge_index[:, 1, :]
    a = (src[:, :, None] == dst[:, None, :]).astype(jnp.float32)
    a = jnp.maximum(a, jnp.eye(E, dtype=jnp.float32)[None])
    deg = jnp.sum(a, axis=-1, keepdims=True)
    dinv = jax.lax.rsqrt(deg)
    m = a * dinv * jnp.swapaxes(dinv, -1, -2)
    h = edge_attr
    for wk, bk in (("w1", "b1"), ("w2", "b2"), ("w3", "b3")):
        h = jnp.einsum("bij,bjk->bik", m, jnp.einsum("bik,kl->bil", h, params[wk]))
        h = jnp.maximum(h + params[bk], 0.0)
    return jnp.einsum("bik,kl->bil", h, params["wf"]) + params["bf"]


if __name__ == "__main__":
    key = jax.random.PRNGKey(0)
    B, N, E, Fin, FD = 2, 8, 16, 4, 64   # batch, nodes, edges, edge-attr dim, features_dim

    # Deterministic directed graph on N nodes: ring (+1) and skip (+2) edges -> E = 16 edges.
    base = jnp.arange(N, dtype=jnp.int32)
    src = jnp.concatenate([base, base])
    dst = jnp.concatenate([(base + 1) % N, (base + 2) % N])
    edge_index = jnp.broadcast_to(jnp.stack([src, dst], axis=0)[None], (B, 2, E)).astype(jnp.int32)

    keys = jax.random.split(key, 10)
    observations = {
        "x": jax.random.normal(keys[0], (B, N, 3), dtype=jnp.float32),   # unused (LineGraph)
        "edge_index": edge_index,
        "edge_attr": jax.random.normal(keys[1], (B, E, Fin), dtype=jnp.float32),
    }
    params = {
        "w1": 0.50 * jax.random.normal(keys[2], (Fin, 16), dtype=jnp.float32),
        "b1": 0.10 * jax.random.normal(keys[3], (1, 16), dtype=jnp.float32),
        "w2": 0.25 * jax.random.normal(keys[4], (16, 32), dtype=jnp.float32),
        "b2": 0.10 * jax.random.normal(keys[5], (1, 32), dtype=jnp.float32),
        "w3": 0.18 * jax.random.normal(keys[6], (32, 64), dtype=jnp.float32),
        "b3": 0.10 * jax.random.normal(keys[7], (1, 64), dtype=jnp.float32),
        "wf": 0.12 * jax.random.normal(keys[8], (64, FD), dtype=jnp.float32),
        "bf": 0.10 * jax.random.normal(keys[9], (1, FD), dtype=jnp.float32),
    }

    out = gnn_edge_extractor(observations, params)
    out = jax.block_until_ready(out)

    assert out.shape == (B, E, FD), out.shape
    ref = _reference(observations, params)
    assert jnp.allclose(out, ref, rtol=2e-2, atol=2e-2), float(jnp.max(jnp.abs(out - ref)))
    print("KERNEL_OK")
</pallas_src>

<mosaic_0001>
module attributes {stable_mosaic.version = 11 : i64} {
  func.func @_gnn_edge_kernel(%arg0: i32, %arg1: memref<2x16x1xi32, #tpu.memory_space<vmem>>, %arg2: memref<2x1x16xi32, #tpu.memory_space<vmem>>, %arg3: memref<2x16x4xf32, #tpu.memory_space<vmem>>, %arg4: memref<4x16xf32, #tpu.memory_space<vmem>>, %arg5: memref<1x16xf32, #tpu.memory_space<vmem>>, %arg6: memref<16x32xf32, #tpu.memory_space<vmem>>, %arg7: memref<1x32xf32, #tpu.memory_space<vmem>>, %arg8: memref<32x64xf32, #tpu.memory_space<vmem>>, %arg9: memref<1x64xf32, #tpu.memory_space<vmem>>, %arg10: memref<64x64xf32, #tpu.memory_space<vmem>>, %arg11: memref<1x64xf32, #tpu.memory_space<vmem>>, %arg12: memref<2x16x64xf32, #tpu.memory_space<vmem>>) attributes {dimension_semantics = [#tpu.dimension_semantics<parallel>], iteration_bounds = array<i64: 1>, scalar_prefetch = 0 : i64, scratch_operands = 0 : i64, tpu.core_type = #tpu.core_type<tc>, window_params = [{transform_indices = @transform_0, window_bounds = array<i64: 2, 16, 1>}, {transform_indices = @transform_1, window_bounds = array<i64: 2, 1, 16>}, {transform_indices = @transform_2, window_bounds = array<i64: 2, 16, 4>}, {pipeline_mode = #tpu.pipeline_mode<synchronous>, transform_indices = @transform_3, window_bounds = array<i64: 4, 16>}, {pipeline_mode = #tpu.pipeline_mode<synchronous>, transform_indices = @transform_4, window_bounds = array<i64: 1, 16>}, {pipeline_mode = #tpu.pipeline_mode<synchronous>, transform_indices = @transform_5, window_bounds = array<i64: 16, 32>}, {pipeline_mode = #tpu.pipeline_mode<synchronous>, transform_indices = @transform_6, window_bounds = array<i64: 1, 32>}, {pipeline_mode = #tpu.pipeline_mode<synchronous>, transform_indices = @transform_7, window_bounds = array<i64: 32, 64>}, {pipeline_mode = #tpu.pipeline_mode<synchronous>, transform_indices = @transform_8, window_bounds = array<i64: 1, 64>}, {pipeline_mode = #tpu.pipeline_mode<synchronous>, transform_indices = @transform_9, window_bounds = array<i64: 64, 64>}, {pipeline_mode = #tpu.pipeline_mode<synchronous>, transform_indices = @transform_10, window_bounds = array<i64: 1, 64>}, {transform_indices = @transform_11, window_bounds = array<i64: 2, 16, 64>}]} {
    %c0 = arith.constant 0 : index
    %c0_0 = arith.constant 0 : index
    %c0_1 = arith.constant 0 : index
    %0 = vector.load %arg1[%c0, %c0_0, %c0_1] : memref<2x16x1xi32, #tpu.memory_space<vmem>>, vector<2x16x1xi32>
    %c0_2 = arith.constant 0 : index
    %c0_3 = arith.constant 0 : index
    %c0_4 = arith.constant 0 : index
    %1 = vector.load %arg2[%c0_2, %c0_3, %c0_4] : memref<2x1x16xi32, #tpu.memory_space<vmem>>, vector<2x1x16xi32>
    %2 = vector.broadcast %0 : vector<2x16x1xi32> to vector<2x16x16xi32>
    %3 = vector.broadcast %1 : vector<2x1x16xi32> to vector<2x16x16xi32>
    %4 = arith.cmpi eq, %2, %3 : vector<2x16x16xi32>
    %cst = arith.constant 1.000000e+00 : f32
    %cst_5 = arith.constant 0.000000e+00 : f32
    %5 = vector.broadcast %cst : f32 to vector<2x16x16xf32>
    %6 = vector.broadcast %cst_5 : f32 to vector<2x16x16xf32>
    %7 = arith.select %4, %5, %6 : vector<2x16x16xi1>, vector<2x16x16xf32>
    %8 = tpu.iota {dimensions = array<i32: 0>} : vector<16x16xi32>
    %9 = tpu.iota {dimensions = array<i32: 1>} : vector<16x16xi32>
    %10 = arith.cmpi eq, %8, %9 : vector<16x16xi32>
    %cst_6 = arith.constant 1.000000e+00 : f32
    %cst_7 = arith.constant 0.000000e+00 : f32
    %11 = vector.broadcast %cst_6 : f32 to vector<16x16xf32>
    %12 = vector.broadcast %cst_7 : f32 to vector<16x16xf32>
    %13 = arith.select %10, %11, %12 : vector<16x16xi1>, vector<16x16xf32>
    %14 = vector.shape_cast %13 : vector<16x16xf32> to vector<1x16x16xf32>
    %15 = vector.broadcast %14 : vector<1x16x16xf32> to vector<2x16x16xf32>
    %16 = arith.maximumf %7, %15 : vector<2x16x16xf32>
    %cst_8 = arith.constant dense<0.000000e+00> : vector<2x16xf32>
    %17 = vector.multi_reduction <add>, %16, %cst_8 [2] : vector<2x16x16xf32> to vector<2x16xf32>
    %18 = vector.shape_cast %17 : vector<2x16xf32> to vector<2x16x1xf32>
    %19 = math.rsqrt %18 : vector<2x16x1xf32>
    %c0_9 = arith.constant 0 : index
    %c0_10 = arith.constant 0 : index
    %c0_11 = arith.constant 0 : index
    %20 = vector.load %arg3[%c0_9, %c0_10, %c0_11] : memref<2x16x4xf32, #tpu.memory_space<vmem>>, vector<2x16x4xf32>
    %21 = vector.broadcast %19 : vector<2x16x1xf32> to vector<2x16x4xf32>
    %22 = arith.mulf %21, %20 : vector<2x16x4xf32>
    "tpu.trace_start"() <{level = 10 : i32, message = "bij,bjk->bik"}> : () -> ()
    %cst_12 = arith.constant dense<0.000000e+00> : vector<2x16x4xf32>
    %23 = tpu.matmul %16, %22, %cst_12 {dimension_numbers = #tpu.dot_dimension_numbers<[2], [1], [1], [2], [0, 0, 0, 1, 1, 2], [0], [0]>} : vector<2x16x16xf32>, vector<2x16x4xf32>, vector<2x16x4xf32> -> vector<2x16x4xf32>
    "tpu.trace_stop"() : () -> ()
    %24 = vector.broadcast %19 : vector<2x16x1xf32> to vector<2x16x4xf32>
    %25 = arith.mulf %24, %23 : vector<2x16x4xf32>
    %26 = vector.shape_cast %25 : vector<2x16x4xf32> to vector<32x4xf32>
    %c0_13 = arith.constant 0 : index
    %c0_14 = arith.constant 0 : index
    %27 = vector.load %arg4[%c0_13, %c0_14] : memref<4x16xf32, #tpu.memory_space<vmem>>, vector<4x16xf32>
    %cst_15 = arith.constant dense<0.000000e+00> : vector<32x16xf32>
    %28 = tpu.matmul %26, %27, %cst_15 {dimension_numbers = #tpu.dot_dimension_numbers<[1], [0], [0], [1], [0, 0, 1, 1], [], []>} : vector<32x4xf32>, vector<4x16xf32>, vector<32x16xf32> -> vector<32x16xf32>
    %c0_16 = arith.constant 0 : index
    %c0_17 = arith.constant 0 : index
    %29 = vector.load %arg5[%c0_16, %c0_17] : memref<1x16xf32, #tpu.memory_space<vmem>>, vector<1x16xf32>
    %30 = vector.broadcast %29 : vector<1x16xf32> to vector<32x16xf32>
    %31 = arith.addf %28, %30 : vector<32x16xf32>
    %cst_18 = arith.constant 0.000000e+00 : f32
    %32 = vector.broadcast %cst_18 : f32 to vector<32x16xf32>
    %33 = arith.maximumf %31, %32 : vector<32x16xf32>
    %34 = vector.shape_cast %33 : vector<32x16xf32> to vector<2x16x16xf32>
    %35 = vector.broadcast %19 : vector<2x16x1xf32> to vector<2x16x16xf32>
    %36 = arith.mulf %35, %34 : vector<2x16x16xf32>
    "tpu.trace_start"() <{level = 10 : i32, message = "bij,bjk->bik"}> : () -> ()
    %cst_19 = arith.constant dense<0.000000e+00> : vector<2x16x16xf32>
    %37 = tpu.matmul %16, %36, %cst_19 {dimension_numbers = #tpu.dot_dimension_numbers<[2], [1], [1], [2], [0, 0, 0, 1, 1, 2], [0], [0]>} : vector<2x16x16xf32>, vector<2x16x16xf32>, vector<2x16x16xf32> -> vector<2x16x16xf32>
    "tpu.trace_stop"() : () -> ()
    %38 = vector.broadcast %19 : vector<2x16x1xf32> to vector<2x16x16xf32>
    %39 = arith.mulf %38, %37 : vector<2x16x16xf32>
    %40 = vector.shape_cast %39 : vector<2x16x16xf32> to vector<32x16xf32>
    %c0_20 = arith.constant 0 : index
    %c0_21 = arith.constant 0 : index
    %41 = vector.load %arg6[%c0_20, %c0_21] : memref<16x32xf32, #tpu.memory_space<vmem>>, vector<16x32xf32>
    %cst_22 = arith.constant dense<0.000000e+00> : vector<32x32xf32>
    %42 = tpu.matmul %40, %41, %cst_22 {dimension_numbers = #tpu.dot_dimension_numbers<[1], [0], [0], [1], [0, 0, 1, 1], [], []>} : vector<32x16xf32>, vector<16x32xf32>, vector<32x32xf32> -> vector<32x32xf32>
    %c0_23 = arith.constant 0 : index
    %c0_24 = arith.constant 0 : index
    %43 = vector.load %arg7[%c0_23, %c0_24] : memref<1x32xf32, #tpu.memory_space<vmem>>, vector<1x32xf32>
    %44 = vector.broadcast %43 : vector<1x32xf32> to vector<32x32xf32>
    %45 = arith.addf %42, %44 : vector<32x32xf32>
    %cst_25 = arith.constant 0.000000e+00 : f32
    %46 = vector.broadcast %cst_25 : f32 to vector<32x32xf32>
    %47 = arith.maximumf %45, %46 : vector<32x32xf32>
    %48 = vector.shape_cast %47 : vector<32x32xf32> to vector<2x16x32xf32>
    %49 = vector.broadcast %19 : vector<2x16x1xf32> to vector<2x16x32xf32>
    %50 = arith.mulf %49, %48 : vector<2x16x32xf32>
    "tpu.trace_start"() <{level = 10 : i32, message = "bij,bjk->bik"}> : () -> ()
    %cst_26 = arith.constant dense<0.000000e+00> : vector<2x16x32xf32>
    %51 = tpu.matmul %16, %50, %cst_26 {dimension_numbers = #tpu.dot_dimension_numbers<[2], [1], [1], [2], [0, 0, 0, 1, 1, 2], [0], [0]>} : vector<2x16x16xf32>, vector<2x16x32xf32>, vector<2x16x32xf32> -> vector<2x16x32xf32>
    "tpu.trace_stop"() : () -> ()
    %52 = vector.broadcast %19 : vector<2x16x1xf32> to vector<2x16x32xf32>
    %53 = arith.mulf %52, %51 : vector<2x16x32xf32>
    %54 = vector.shape_cast %53 : vector<2x16x32xf32> to vector<32x32xf32>
    %c0_27 = arith.constant 0 : index
    %c0_28 = arith.constant 0 : index
    %55 = vector.load %arg8[%c0_27, %c0_28] : memref<32x64xf32, #tpu.memory_space<vmem>>, vector<32x64xf32>
    %cst_29 = arith.constant dense<0.000000e+00> : vector<32x64xf32>
    %56 = tpu.matmul %54, %55, %cst_29 {dimension_numbers = #tpu.dot_dimension_numbers<[1], [0], [0], [1], [0, 0, 1, 1], [], []>} : vector<32x32xf32>, vector<32x64xf32>, vector<32x64xf32> -> vector<32x64xf32>
    %c0_30 = arith.constant 0 : index
    %c0_31 = arith.constant 0 : index
    %57 = vector.load %arg9[%c0_30, %c0_31] : memref<1x64xf32, #tpu.memory_space<vmem>>, vector<1x64xf32>
    %58 = vector.broadcast %57 : vector<1x64xf32> to vector<32x64xf32>
    %59 = arith.addf %56, %58 : vector<32x64xf32>
    %cst_32 = arith.constant 0.000000e+00 : f32
    %60 = vector.broadcast %cst_32 : f32 to vector<32x64xf32>
    %61 = arith.maximumf %59, %60 : vector<32x64xf32>
    %62 = vector.shape_cast %61 : vector<32x64xf32> to vector<2x16x64xf32>
    %63 = vector.shape_cast %62 : vector<2x16x64xf32> to vector<32x64xf32>
    %c0_33 = arith.constant 0 : index
    %c0_34 = arith.constant 0 : index
    %64 = vector.load %arg10[%c0_33, %c0_34] : memref<64x64xf32, #tpu.memory_space<vmem>>, vector<64x64xf32>
    %cst_35 = arith.constant dense<0.000000e+00> : vector<32x64xf32>
    %65 = tpu.matmul %63, %64, %cst_35 {dimension_numbers = #tpu.dot_dimension_numbers<[1], [0], [0], [1], [0, 0, 1, 1], [], []>} : vector<32x64xf32>, vector<64x64xf32>, vector<32x64xf32> -> vector<32x64xf32>
    %c0_36 = arith.constant 0 : index
    %c0_37 = arith.constant 0 : index
    %66 = vector.load %arg11[%c0_36, %c0_37] : memref<1x64xf32, #tpu.memory_space<vmem>>, vector<1x64xf32>
    %67 = vector.broadcast %66 : vector<1x64xf32> to vector<32x64xf32>
    %68 = arith.addf %65, %67 : vector<32x64xf32>
    %69 = vector.shape_cast %68 : vector<32x64xf32> to vector<2x16x64xf32>
    %c0_38 = arith.constant 0 : index
    %c0_39 = arith.constant 0 : index
    %c0_40 = arith.constant 0 : index
    %70 = vector.load %arg12[%c0_38, %c0_39, %c0_40] : memref<2x16x64xf32, #tpu.memory_space<vmem>>, vector<2x16x64xf32>
    tpu.vector_store %arg12[%c0_38, %c0_39, %c0_40], %69 {strides = array<i32>} : memref<2x16x64xf32, #tpu.memory_space<vmem>>, vector<2x16x64xf32>,
    return
  }
  func.func @transform_0(%arg0: i32) -> (i32, i32, i32) {
    %c0_i32 = arith.constant 0 : i32
    %c0_i32_0 = arith.constant 0 : i32
    %c0_i32_1 = arith.constant 0 : i32
    return %arg0, %c0_i32, %c0_i32_0 : i32, i32, i32
  }
  func.func @transform_1(%arg0: i32) -> (i32, i32, i32) {
    %c0_i32 = arith.constant 0 : i32
    %c0_i32_0 = arith.constant 0 : i32
    %c0_i32_1 = arith.constant 0 : i32
    return %arg0, %c0_i32, %c0_i32_0 : i32, i32, i32
  }
  func.func @transform_2(%arg0: i32) -> (i32, i32, i32) {
    %c0_i32 = arith.constant 0 : i32
    %c0_i32_0 = arith.constant 0 : i32
    %c0_i32_1 = arith.constant 0 : i32
    return %arg0, %c0_i32, %c0_i32_0 : i32, i32, i32
  }
  func.func @transform_3(%arg0: i32) -> (i32, i32) {
    %c0_i32 = arith.constant 0 : i32
    %c0_i32_0 = arith.constant 0 : i32
    %c0_i32_1 = arith.constant 0 : i32
    return %c0_i32, %c0_i32_0 : i32, i32
  }
  func.func @transform_4(%arg0: i32) -> (i32, i32) {
    %c0_i32 = arith.constant 0 : i32
    %c0_i32_0 = arith.constant 0 : i32
    %c0_i32_1 = arith.constant 0 : i32
    return %c0_i32, %c0_i32_0 : i32, i32
  }
  func.func @transform_5(%arg0: i32) -> (i32, i32) {
    %c0_i32 = arith.constant 0 : i32
    %c0_i32_0 = arith.constant 0 : i32
    %c0_i32_1 = arith.constant 0 : i32
    return %c0_i32, %c0_i32_0 : i32, i32
  }
  func.func @transform_6(%arg0: i32) -> (i32, i32) {
    %c0_i32 = arith.constant 0 : i32
    %c0_i32_0 = arith.constant 0 : i32
    %c0_i32_1 = arith.constant 0 : i32
    return %c0_i32, %c0_i32_0 : i32, i32
  }
  func.func @transform_7(%arg0: i32) -> (i32, i32) {
    %c0_i32 = arith.constant 0 : i32
    %c0_i32_0 = arith.constant 0 : i32
    %c0_i32_1 = arith.constant 0 : i32
    return %c0_i32, %c0_i32_0 : i32, i32
  }
  func.func @transform_8(%arg0: i32) -> (i32, i32) {
    %c0_i32 = arith.constant 0 : i32
    %c0_i32_0 = arith.constant 0 : i32
    %c0_i32_1 = arith.constant 0 : i32
    return %c0_i32, %c0_i32_0 : i32, i32
  }
  func.func @transform_9(%arg0: i32) -> (i32, i32) {
    %c0_i32 = arith.constant 0 : i32
    %c0_i32_0 = arith.constant 0 : i32
    %c0_i32_1 = arith.constant 0 : i32
    return %c0_i32, %c0_i32_0 : i32, i32
  }
  func.func @transform_10(%arg0: i32) -> (i32, i32) {
    %c0_i32 = arith.constant 0 : i32
    %c0_i32_0 = arith.constant 0 : i32
    %c0_i32_1 = arith.constant 0 : i32
    return %c0_i32, %c0_i32_0 : i32, i32
  }
  func.func @transform_11(%arg0: i32) -> (i32, i32, i32) {
    %c0_i32 = arith.constant 0 : i32
    %c0_i32_0 = arith.constant 0 : i32
    %c0_i32_1 = arith.constant 0 : i32
    return %arg0, %c0_i32, %c0_i32_0 : i32, i32, i32
  }
}

</mosaic_0001>

<bundles_post_ra>
// kernel: tpu_custom_call.1
= control target key start
LH: loop header
LB: loop body
LE: loop exit
PB: predicated region body
PF: predicated region fallthrough
CT: control target
= control target key end

     0   :  { %16 = vsyncpa [#allocation3], 0  ;;  %s1561_s0 = inlined_call_operand.vmem [shape: s32[2,16,1], index: 0, kind: input, shape index: {}]   ;;  %s1562_s1 = inlined_call_operand.vmem [shape: s32[2,1,16], index: 1, kind: input, shape index: {}]   ;;  %s1563_s2 = inlined_call_operand.vmem [shape: f32[2,16,4], index: 2, kind: input, shape index: {}]   ;;  %s1564_s3 = inlined_call_operand.vmem [shape: f32[4,16], index: 3, kind: input, shape index: {}]   ;;  %s1565_s4 = inlined_call_operand.vmem [shape: f32[1,16], index: 4, kind: input, shape index: {}]   ;;  %s1566_s5 = inlined_call_operand.vmem [shape: f32[16,32], index: 5, kind: input, shape index: {}]   ;;  %s1567_s6 = inlined_call_operand.vmem [shape: f32[1,32], index: 6, kind: input, shape index: {}]   ;;  %s1568_s7 = inlined_call_operand.hbm [shape: f32[32,64], index: 7, kind: input, shape index: {}]   ;;  %s1569_s8 = inlined_call_operand.vmem [shape: f32[1,64], index: 8, kind: input, shape index: {}]   ;;  %s1570_s9 = inlined_call_operand.vmem [shape: f32[64,64], index: 9, kind: input, shape index: {}]   ;;  %s1571_s10 = inlined_call_operand.vmem [shape: f32[1,64], index: 10, kind: input, shape index: {}]   ;;  %s1572_s11 = inlined_call_operand.hbm [shape: f32[2,16,64], index: 11, kind: output, shape index: {}]  }
   0x1   :  { %17 = vsyncpa [#allocation4], 0  ;;  %s1324_s17 = smov [#allocation2]  }
   0x2   :  { %s37_s18 = sshll.u32 %s1324_s17, 4  ;;  %s38_s18 = int_to_ptr.vmem [resolvable:$true] %s37_s18 }
   0x3   :  { %s1288_s19 = scalar_lea.vmem %s38_s18, 512  ;;  %p1293_p1 = scmp.lt.s32.totalorder %s38_s18, %s38_s18 }
   0x4   :  { %p1289_p0 = scmp.ne.s32.totalorder %s38_s18, %s1288_s19  ;;  %p1294_p2 = scmp.lt.s32.totalorder %s1288_s19, %s1288_s19 }
   0x6   :  { %p1295_p3 = por %p1294_p2, %p1293_p1 }
   0x8   :  { %p1296_p4 = pnand %p1295_p3, %p1289_p0 }
   0xa   :  { %1299 = shalt.err (!%p1296_p4)
}
   0xb   :  { %s1325_s20 = smov 128   ;;  %s1326_s21 = smov 8  }
   0xc   :  { %43 = dma.hbm_to_vmem [thread:$0]  %s1568_s7, 512, %s38_s18, [#allocation3], %s1325_s20, %s1325_s20, %s1326_s21  }
   0xd   :  { %1320 = dma.done.wait [#allocation3], 512  }
   0xe   :  { %1321 = vsyncadd [#allocation3], 4294966784  ;;  %v1327_v0 = vmov 0   ;;  %v56_v1 = vld [vmem:[%s1561_s0 + $0x18] sm:$0xff]  ;;  %v54_v2 = vld [vmem:[%s1561_s0 + $0x8] sm:$0xff]  ;;  %v87_v5 = vlaneseq  ;;  %v1328_v11 = vmov 0.0  }
   0xf   :  { %1271 = vset.pattern.permute.xlu1 %v1327_v0  ;;  %1270 = vset.pattern.permute.xlu0 %v1327_v0  ;;  %v55_v3 = vld [vmem:[%s1561_s0 + $0x10] sm:$0xff]  ;;  %v53_v4 = vld [vmem:[%s1561_s0] sm:$0xff]  ;;  %vm100_vm4 = vcmask 130048   ;;  %v118_v34 = vld [vmem:[%s1563_s2 + $0x8] sm:$0xff]  ;;  %vm312_vm7 = vcmask 1043456   ;;  %vm299_vm8 = vcmask 31744  }
  0x10   :  { %69 = vperm.xlu1 %1271, %v56_v1   ;;  %63 = vperm.xlu0 %1270, %v54_v2   ;;  %v88_v6 = vshrl.u32 %v87_v5, 7  ;;  %v91_v8 = vand.u32 127, %v87_v5  ;;  %v1079_v9 = vld [vmem:[%s1562_s1 + $0x1] ss:$0 sm:$0xff]  ;;  %v1078_v10 = vld [vmem:[%s1562_s1] ss:$0 sm:$0xff] }
  0x11   :  { %v117_v37 = vld [vmem:[%s1563_s2] sm:$0xff]  ;;  %v120_v39 = vld [vmem:[%s1563_s2 + $0x18] sm:$0xff]  ;;  %v119_v42 = vld [vmem:[%s1563_s2 + $0x10] sm:$0xff]  ;;  %vm842_vm9 = vcmask 261120   ;;  %vm959_vm10 = vcmask 523264   ;;  %s1329_s25 = smov [#allocation5]  }
  0x12   :  { %v89_v7 = vadd.s32 8, %v88_v6  ;;  %vm92_vm3 = vcmp.eq.s32.totalorder %v88_v6, %v91_v8  ;;  %v291_v46 = vld [vmem:[%s1564_s3] sm:$0xf]  ;;  %v564_v55 = vld [vmem:[%s1566_s5 + $0x8] sm:$0xff]  ;;  %s1066_s26 = sshll.u32 %s1329_s25, 4  ;;  %s1067_s26 = int_to_ptr.vmem [resolvable:$true] %s1066_s26 }
  0x13   :  { %v94_v19 = vsel %vm92_vm3, 1.0, %v1328_v11  ;;  %v1084_v56 = vld [vmem:[%s1565_s4] ss:$0 sm:$0xff]  ;;  %p1305_p6 = scmp.lt.s32.totalorder %s1067_s26, %s1067_s26 }
  0x14   :  { %66 = vperm.xlu1 %1271, %v55_v3   ;;  %60 = vperm.xlu0 %1270, %v53_v4   ;;  %vm93_vm0 = vcmp.eq.s32.totalorder %v89_v7, %v91_v8 }
  0x15   :  { %v95_v12 = vsel %vm93_vm0, 1.0, %v1328_v11 }
  0x8b   :  { %v70_v13 = vpop.permute.xlu1 %69  ;;  %v64_v14 = vpop.permute.xlu0 %63 }
  0x8c   :  { %vm82_vm1 = vcmp.eq.s32.totalorder %v70_v13, %v1079_v9  ;;  %vm80_vm2 = vcmp.eq.s32.totalorder %v64_v14, %v1078_v10 }
  0x8d   :  { %v86_v15 = vsel %vm82_vm1, 1.0, %v1328_v11  ;;  %v84_v16 = vsel %vm80_vm2, 1.0, %v1328_v11 }
  0x8e   :  { %v1414_v17 = vmax.f32 %v86_v15, %v95_v12  ;;  %v1416_v18 = vmax.f32 %v84_v16, %v95_v12 }
  0x8f   :  { %v67_v20 = vpop.permute.xlu1 %66  ;;  %v61_v21 = vpop.permute.xlu0 %60 }
  0x90   :  { %vm81_vm5 = vcmp.eq.s32.totalorder %v67_v20, %v1079_v9  ;;  %vm79_vm6 = vcmp.eq.s32.totalorder %v61_v21, %v1078_v10  ;;  %v104_v22 = vsel %vm100_vm4, %v1416_v18, 0.0  ;;  %v110_v26 = vsel %vm100_vm4, %v1414_v17, 0.0  ;;  %v563_v9 = vld [vmem:[%s1566_s5] sm:$0xff]  ;;  %v834_v20 = vld [vmem:[#allocation2 + $0x18] sm:$0xff] }
  0x91   :  { %v85_v23 = vsel %vm81_vm5, 1.0, %v1328_v11  ;;  %v83_v24 = vsel %vm79_vm6, 1.0, %v1328_v11  ;;  %105 = vadd.xlane.f32.xlu0 %v104_v22  ;;  %v1094_v21 = vld [vmem:[%s1567_s6] ss:$0 sm:$0xff] }
  0x92   :  { %v1420_v25 = vmax.f32 %v83_v24, %v94_v19  ;;  %v1424_v27 = vmax.f32 %v85_v23, %v94_v19 }
  0x94   :  { %1172 = vmatprep.mubr.msk.f32.mxu0 %vm100_vm4, %v1420_v25  ;;  %1194 = vmatprep.mubr.msk.f32.mxu1 %vm100_vm4, %v1420_v25  ;;  %v101_v28 = vsel %vm100_vm4, %v1420_v25, 0.0  ;;  %v107_v29 = vsel %vm100_vm4, %v1424_v27, 0.0 }
  0x95   :  { %111 = vadd.xlane.f32.xlu0 %v110_v26  ;;  %102 = vadd.xlane.f32.xlu1 %v101_v28 }
  0x99   :  { %108 = vadd.xlane.f32.xlu0 %v107_v29 }
 0x11a   :  { %v106_v30 = vpop.xlane.xlu0 %105 }
 0x11b   :  { %1272 = vrsqrt.f32 %v106_v30 }
 0x11e   :  { %v103_v31 = vpop.xlane.xlu1 %102  ;;  %v112_v32 = vpop.xlane.xlu0 %111 }
 0x11f   :  { %1274 = vrsqrt.f32 %v103_v31 }
 0x120   :  { %1276 = vrsqrt.f32 %v112_v32 }
 0x122   :  { %v109_v33 = vpop.xlane.xlu0 %108 }
 0x123   :  { %1278 = vrsqrt.f32 %v109_v33 }
 0x128   :  { %v1437_v35 = vpop.eup %1272 }
 0x129   :  { %v122_v36 = vmul.f32 %v1437_v35, %v118_v34 }
 0x12b   :  { %1168 = vmatprep.subr.mxu0 %v122_v36 }
 0x12c   :  { %v1443_v38 = vpop.eup %1274  ;;  %1169 = vmatpush3.msra.mxu0 %v122_v36 }
 0x12d   :  { %v1448_v40 = vpop.eup %1276  ;;  %v121_v41 = vmul.f32 %v1443_v38, %v117_v37 }
 0x12e   :  { %v124_v43 = vmul.f32 %v1448_v40, %v120_v39 }
 0x12f   :  { %1170 = vmatprep.subr.mxu0 %v121_v41 }
 0x130   :  { %v1455_v44 = vpop.eup %1278  ;;  %1171 = vmatpush3.msra.mxu0 %v121_v41 }
 0x131   :  { %1173 = vmatmul.mubr.msk.f32.vlgmr.msra.gmra.mxu0 %vm100_vm4, %v1416_v18  ;;  %1175 = vmatprep.subr.mxu0 %v124_v43  ;;  %v123_v45 = vmul.f32 %v1455_v44, %v119_v42  ;;  %v833_v42 = vld [vmem:[#allocation2 + $0x10] sm:$0xff] }
 0x132   :  { %1176 = vmatpush3.msra.mxu0 %v124_v43  ;;  %1179 = vmatprep.mubr.msk.f32.mxu0 %vm100_vm4, %v1424_v27  ;;  %v832_v43 = vld [vmem:[#allocation2 + $0x8] sm:$0xff] }
 0x133   :  { %1177 = vmatprep.subr.mxu0 %v123_v45 }
 0x134   :  { %1178 = vmatpush3.msra.mxu0 %v123_v45  ;;  %v831_v45 = vld [vmem:[#allocation2] sm:$0xff] }
 0x135   :  { %1180 = vmatmul.mubr.msk.f32.vlgmr.msra.gmra.mxu0 %vm100_vm4, %v1414_v17  ;;  %1182 = vmatprep.subr.msk.mxu0 %vm312_vm7, %v291_v46 }
 0x136   :  { %1183 = vmatpush3.msk.msra.mxu0 %vm312_vm7, %v291_v46  ;;  %v948_v46 = vld [vmem:[%s1570_s9 + $0x20] sm:$0xff] }
 0x137   :  { %1204 = vmatprep.subr.mxu0 %v564_v55 }
 0x1f1   :  { %v1174_v47 = vpop.f32.mrf.mxu0 }
 0x1f2   :  { %v288_v50 = vmul.f32 %v1437_v35, %v1174_v47 }
 0x1f3   :  { %v197_v48 = vpop.f32.mrf.mxu0 }
 0x1f4   :  { %v287_v49 = vmul.f32 %v1443_v38, %v197_v48 }
 0x1f5   :  { %v1181_v51 = vpop.f32.mrf.mxu0 }
 0x1f6   :  { %1184 = vmatprep.mubr.msk.f32.mxu0 %vm299_vm8, %v287_v49  ;;  %v290_v54 = vmul.f32 %v1448_v40, %v1181_v51 }
 0x1f7   :  { %v278_v52 = vpop.f32.mrf.mxu0  ;;  %1185 = vmatmul.mubr.msk.f32.vlgmr.msra.gmra.mxu0 %vm299_vm8, %v288_v50 }
 0x1f8   :  { %v289_v53 = vmul.f32 %v1455_v44, %v278_v52  ;;  %1205 = vmatpush3.msra.mxu0 %v564_v55  ;;  %v947_v55 = vld [vmem:[%s1570_s9 + $0x18] sm:$0xff] }
 0x1f9   :  { %1206 = vmatprep.subr.mxu0 %v563_v9 }
 0x1fa   :  { %1187 = vmatprep.mubr.msk.f32.mxu0 %vm299_vm8, %v289_v53  ;;  %1207 = vmatpush3.msra.mxu0 %v563_v9 }
 0x1fb   :  { %1188 = vmatmul.mubr.msk.f32.gmra.mxu0 %vm299_vm8, %v290_v54  ;;  %1228 = vmatprep.subr.mxu0 %v834_v20 }
 0x2b7   :  { %v1186_v57 = vpop.f32.mrf.mxu0 }
 0x2b8   :  { %v388_v58 = vadd.f32 %v1186_v57, %v1084_v56 }
 0x2b9   :  { %v382_v59 = vpop.f32.mrf.mxu0 }
 0x2ba   :  { %v402_v60 = vmax.f32 %v388_v58, 0.0  ;;  %v383_v61 = vadd.f32 %v1084_v56, %v382_v59 }
 0x2bb   :  { %v1189_v62 = vpop.f32.mrf.mxu0 }
 0x2bc   :  { %v401_v63 = vmax.f32 %v383_v61, 0.0  ;;  %v398_v0 = vadd.f32 %v1189_v62, %v1084_v56  ;;  %v406_v1 = vmul.f32 %v1437_v35, %v402_v60 }
 0x2bd   :  { %v392_v2 = vpop.f32.mrf.mxu0 }
 0x2be   :  { %v405_v3 = vmul.f32 %v1443_v38, %v401_v63  ;;  %v404_v4 = vmax.f32 %v398_v0, 0.0  ;;  %v393_v5 = vadd.f32 %v1084_v56, %v392_v2  ;;  %1190 = vmatprep.subr.mxu1 %v406_v1 }
 0x2bf   :  { %1191 = vmatpush3.msra.mxu1 %v406_v1 }
 0x2c0   :  { %v408_v6 = vmul.f32 %v1448_v40, %v404_v4  ;;  %v403_v7 = vmax.f32 %v393_v5, 0.0  ;;  %1192 = vmatprep.subr.mxu1 %v405_v3  ;;  %v1108_v4 = vld [vmem:[%s1571_s10] ss:$0 sm:$0xff]  ;;  %s1300_s10 = scalar_lea.vmem %s1067_s26, 512 }
 0x2c1   :  { %1193 = vmatpush3.msra.mxu1 %v405_v3  ;;  %p1301_p5 = scmp.ne.s32.totalorder %s1067_s26, %s1300_s10  ;;  %p1306_p7 = scmp.lt.s32.totalorder %s1300_s10, %s1300_s10 }
 0x2c2   :  { %v407_v8 = vmul.f32 %v1455_v44, %v403_v7  ;;  %1195 = vmatmul.mubr.msk.f32.vlgmr.msra.gmra.mxu1 %vm100_vm4, %v1416_v18  ;;  %1197 = vmatprep.subr.mxu1 %v408_v6 }
 0x2c3   :  { %1198 = vmatpush3.msra.mxu1 %v408_v6  ;;  %1201 = vmatprep.mubr.msk.f32.mxu1 %vm100_vm4, %v1424_v27  ;;  %p1307_p8 = por %p1306_p7, %p1305_p6 }
 0x2c4   :  { %1199 = vmatprep.subr.mxu1 %v407_v8 }
 0x2c5   :  { %1200 = vmatpush3.msra.mxu1 %v407_v8  ;;  %p1308_p9 = pnand %p1307_p8, %p1301_p5 }
 0x2c6   :  { %1202 = vmatmul.mubr.msk.f32.vlgmr.msra.gmra.mxu1 %vm100_vm4, %v1414_v17 }
 0x2c7   :  { %1218 = vmatprep.mubr.msk.f32.mxu1 %vm100_vm4, %v1420_v25 }
 0x382   :  { %v1196_v10 = vpop.f32.mrf.mxu1 }
 0x383   :  { %v560_v13 = vmul.f32 %v1437_v35, %v1196_v10 }
 0x384   :  { %v475_v11 = vpop.f32.mrf.mxu1 }
 0x385   :  { %v559_v12 = vmul.f32 %v1443_v38, %v475_v11 }
 0x386   :  { %v1203_v14 = vpop.f32.mrf.mxu1 }
 0x387   :  { %1208 = vmatprep.mubr.msk.f32.mxu0 %vm100_vm4, %v559_v12  ;;  %v562_v19 = vmul.f32 %v1448_v40, %v1203_v14 }
 0x388   :  { %v550_v15 = vpop.f32.mrf.mxu1  ;;  %1209 = vmatmul.mubr.msk.f32.vlgmr.msra.gmra.mxu0 %vm100_vm4, %v560_v13 }
 0x389   :  { %v561_v16 = vmul.f32 %v1455_v44, %v550_v15  ;;  %1229 = vmatpush3.msra.mxu0 %v834_v20 }
 0x38a   :  { %1230 = vmatprep.subr.mxu0 %v833_v42 }
 0x38b   :  { %1211 = vmatprep.mubr.msk.f32.mxu0 %vm100_vm4, %v561_v16  ;;  %1231 = vmatpush3.msra.mxu0 %v833_v42 }
 0x38c   :  { %1212 = vmatmul.mubr.msk.f32.gmra.mxu0 %vm100_vm4, %v562_v19  ;;  %1232 = vmatprep.subr.mxu0 %v832_v43 }
 0x38d   :  { %1233 = vmatpush3.msra.mxu0 %v832_v43 }
 0x38e   :  { %1234 = vmatprep.subr.mxu0 %v831_v45 }
 0x38f   :  { %1235 = vmatpush3.msra.mxu0 %v831_v45 }
 0x448   :  { %v1210_v22 = vpop.f32.mrf.mxu0 }
 0x449   :  { %v656_v23 = vadd.f32 %v1210_v22, %v1094_v21 }
 0x44a   :  { %v650_v24 = vpop.f32.mrf.mxu0 }
 0x44b   :  { %v670_v25 = vmax.f32 %v656_v23, 0.0  ;;  %v651_v26 = vadd.f32 %v1094_v21, %v650_v24 }
 0x44c   :  { %v1213_v28 = vpop.f32.mrf.mxu0 }
 0x44d   :  { %v674_v29 = vmul.f32 %v1437_v35, %v670_v25  ;;  %v669_v30 = vmax.f32 %v651_v26, 0.0  ;;  %v666_v31 = vadd.f32 %v1213_v28, %v1094_v21 }
 0x44e   :  { %v660_v32 = vpop.f32.mrf.mxu0 }
 0x44f   :  { %v673_v33 = vmul.f32 %v1443_v38, %v669_v30  ;;  %v672_v34 = vmax.f32 %v666_v31, 0.0  ;;  %v661_v36 = vadd.f32 %v1094_v21, %v660_v32  ;;  %1214 = vmatprep.subr.mxu1 %v674_v29 }
 0x450   :  { %1215 = vmatpush3.msra.mxu1 %v674_v29 }
 0x451   :  { %v676_v37 = vmul.f32 %v1448_v40, %v672_v34  ;;  %v671_v39 = vmax.f32 %v661_v36, 0.0  ;;  %1216 = vmatprep.subr.mxu1 %v673_v33 }
 0x452   :  { %1217 = vmatpush3.msra.mxu1 %v673_v33 }
 0x453   :  { %v675_v41 = vmul.f32 %v1455_v44, %v671_v39  ;;  %1219 = vmatmul.mubr.msk.f32.vlgmr.msra.gmra.mxu1 %vm100_vm4, %v1416_v18  ;;  %1221 = vmatprep.subr.mxu1 %v676_v37  ;;  %v951_v18 = vld [vmem:[%s1570_s9 + $0x38] sm:$0xff] }
 0x454   :  { %1222 = vmatpush3.msra.mxu1 %v676_v37  ;;  %1225 = vmatprep.mubr.msk.f32.mxu1 %vm100_vm4, %v1424_v27  ;;  %v950_v27 = vld [vmem:[%s1570_s9 + $0x30] sm:$0xff] }
 0x455   :  { %1223 = vmatprep.subr.mxu1 %v675_v41 }
 0x456   :  { %1224 = vmatpush3.msra.mxu1 %v675_v41 }
 0x457   :  { %1226 = vmatmul.mubr.msk.f32.vlgmr.msra.gmra.mxu1 %vm100_vm4, %v1414_v17  ;;  %1242 = vmatprep.subr.mxu1 %v951_v18  ;;  %v949_v17 = vld [vmem:[%s1570_s9 + $0x28] sm:$0xff] }
 0x458   :  { %1243 = vmatpush3.msra.mxu1 %v951_v18 }
 0x459   :  { %1244 = vmatprep.subr.mxu1 %v950_v27 }
 0x45a   :  { %1245 = vmatpush3.msra.mxu1 %v950_v27 }
 0x45b   :  { %1246 = vmatprep.subr.mxu1 %v949_v17 }
 0x45c   :  { %1247 = vmatpush3.msra.mxu1 %v949_v17 }
 0x45d   :  { %1248 = vmatprep.subr.mxu1 %v948_v46 }
 0x45e   :  { %1249 = vmatpush3.msra.mxu1 %v948_v46 }
 0x45f   :  { %1250 = vmatprep.subr.mxu1 %v947_v55 }
 0x460   :  { %1251 = vmatpush3.msra.mxu1 %v947_v55 }
 0x513   :  { %v1220_v47 = vpop.f32.mrf.mxu1 }
 0x514   :  { %v828_v50 = vmul.f32 %v1437_v35, %v1220_v47  ;;  %v946_v35 = vld [vmem:[%s1570_s9 + $0x10] sm:$0xff] }
 0x515   :  { %v743_v48 = vpop.f32.mrf.mxu1  ;;  %1252 = vmatprep.subr.mxu1 %v946_v35 }
 0x516   :  { %v827_v49 = vmul.f32 %v1443_v38, %v743_v48  ;;  %1253 = vmatpush3.msra.mxu1 %v946_v35  ;;  %v945_v38 = vld [vmem:[%s1570_s9 + $0x8] sm:$0xff] }
 0x517   :  { %v1227_v51 = vpop.f32.mrf.mxu1  ;;  %1254 = vmatprep.subr.mxu1 %v945_v38 }
 0x518   :  { %1236 = vmatprep.mubr.msk.f32.mxu0 %vm842_vm9, %v827_v49  ;;  %v830_v54 = vmul.f32 %v1448_v40, %v1227_v51  ;;  %1255 = vmatpush3.msra.mxu1 %v945_v38  ;;  %v944_v40 = vld [vmem:[%s1570_s9] sm:$0xff] }
 0x519   :  { %v818_v52 = vpop.f32.mrf.mxu1  ;;  %1237 = vmatmul.mubr.msk.f32.vlgmr.msra.gmra.mxu0 %vm842_vm9, %v828_v50  ;;  %1256 = vmatprep.subr.mxu1 %v944_v40 }
 0x51a   :  { %v829_v53 = vmul.f32 %v1455_v44, %v818_v52  ;;  %1257 = vmatpush3.msra.mxu1 %v944_v40  ;;  %v1103_v44 = vld [vmem:[%s1569_s8] ss:$0 sm:$0xff] }
 0x51c   :  { %1239 = vmatprep.mubr.msk.f32.mxu0 %vm842_vm9, %v829_v53 }
 0x51d   :  { %1240 = vmatmul.mubr.msk.f32.gmra.mxu0 %vm842_vm9, %v830_v54 }
 0x5d9   :  { %v1238_v56 = vpop.f32.mrf.mxu0 }
 0x5da   :  { %v927_v57 = vadd.f32 %v1238_v56, %v1103_v44 }
 0x5db   :  { %v921_v58 = vpop.f32.mrf.mxu0 }
 0x5dc   :  { %v922_v59 = vadd.f32 %v1103_v44, %v921_v58  ;;  %v941_v62 = vmax.f32 %v927_v57, 0.0 }
 0x5dd   :  { %v1241_v60 = vpop.f32.mrf.mxu0 }
 0x5de   :  { %v940_v61 = vmax.f32 %v922_v59, 0.0  ;;  %v937_v63 = vadd.f32 %v1241_v60, %v1103_v44 }
 0x5df   :  { %v931_v0 = vpop.f32.mrf.mxu0 }
 0x5e0   :  { %v932_v1 = vadd.f32 %v1103_v44, %v931_v0  ;;  %1258 = vmatprep.mubr.msk.f32.mxu1 %vm959_vm10, %v940_v61  ;;  %v943_v3 = vmax.f32 %v937_v63, 0.0 }
 0x5e1   :  { %1259 = vmatmul.mubr.msk.f32.vlgmr.msra.gmra.mxu1 %vm959_vm10, %v941_v62 }
 0x5e2   :  { %v942_v2 = vmax.f32 %v932_v1, 0.0 }
 0x5e4   :  { %1261 = vmatprep.mubr.msk.f32.mxu1 %vm959_vm10, %v942_v2 }
 0x5e5   :  { %1262 = vmatmul.mubr.msk.f32.gmra.mxu1 %vm959_vm10, %v943_v3 }
 0x6a1   :  { %v1260_v5 = vpop.f32.mrf.mxu1 }
 0x6a2   :  { %v1044_v6 = vadd.f32 %v1260_v5, %v1108_v4 }
 0x6a3   :  { %v1038_v7 = vpop.f32.mrf.mxu1 }
 0x6a4   :  { %1058 = vst.msk [vmem:[#allocation5 + $0x8] sm:$0xff] %vm959_vm10, %v1044_v6  ;;  %v1039_v8 = vadd.f32 %v1108_v4, %v1038_v7 }
 0x6a5   :  { %v1263_v9 = vpop.f32.mrf.mxu1 }
 0x6a6   :  { %1057 = vst.msk [vmem:[#allocation5] sm:$0xff] %vm959_vm10, %v1039_v8  ;;  %v1054_v10 = vadd.f32 %v1263_v9, %v1108_v4 }
 0x6a7   :  { %v1048_v11 = vpop.f32.mrf.mxu1 }
 0x6a8   :  { %1060 = vst.msk [vmem:[#allocation5 + $0x18] sm:$0xff] %vm959_vm10, %v1054_v10  ;;  %v1049_v12 = vadd.f32 %v1108_v4, %v1048_v11 }
 0x6aa   :  { %1059 = vst.msk [vmem:[#allocation5 + $0x10] sm:$0xff] %vm959_vm10, %v1049_v12 }
 0x6ab   :  { %1311 = shalt.err (!%p1308_p9)
}
 0x6ac   :  { %1072 = dma.vmem_to_hbm [thread:$0]  %s1067_s26, 512, %s1572_s11, [#allocation4], %s1325_s20, %s1325_s20, %s1326_s21  }
 0x6ad   :  { %1322 = dma.done.wait [#allocation4], 512  }
 0x6ae   :  { %1323 = vsyncadd [#allocation4], 4294966784 }
 0x6af   :  { %1076 = vsyncpa [#allocation3], 1 }
 0x6b0   :  { %1077 = vsyncpa [#allocation4], 1 }

</bundles_post_ra>
